<compile_context>
chip_gen: v5e
topology: v5e:2x2
jax: 0.10.0
libtpu: 0.0.40
codegen_flags: <defaults>
</compile_context>

<pallas_src>
import jax
import jax.numpy as jnp
from jax.experimental import pallas as pl
from jax.experimental.pallas import tpu as pltpu


def _basicblock_kernel(x_ref, w1_ref, w2_ref, s1_ref, b1_ref, s2_ref, b2_ref,
                       o_ref, xbuf, hbuf):
    # x_ref/o_ref: (Bn, L, C)  bf16  (real channel count C)
    # w1_ref: (5, C, Cp) bf16 ; w2_ref: (5, Cp, Cp) bf16 ; s*/b*: (1, Cp) f32
    # xbuf: (Bn, L+4, C) bf16 halo scratch ; hbuf: (Bn, L+4, Cp) bf16 halo scratch
    Bn, L, C = x_ref.shape
    Cp = hbuf.shape[-1]
    R = Bn * L

    def conv5(src_ref, w_ref):
        """'same' 5-tap conv over L: 5 accumulating MXU matmuls reading
        shifted sublane slices of a halo'd scratch (no im2col buffer)."""
        K = src_ref.shape[-1]
        acc = jnp.dot(src_ref[:, 0:L, :].reshape(R, K), w_ref[0],
                      preferred_element_type=jnp.float32)
        for k in range(1, 5):
            acc = acc + jnp.dot(src_ref[:, k:k + L, :].reshape(R, K),
                                w_ref[k], preferred_element_type=jnp.float32)
        return acc                                            # (R, Cp) f32

    # Zero the 2+2 halo rows of both scratches every step (cheap; keeps the
    # kernel correct when the parallel batch axis is sharded across cores).
    xz = jnp.zeros((Bn, 2, C), dtype=xbuf.dtype)
    hz = jnp.zeros((Bn, 2, Cp), dtype=hbuf.dtype)
    xbuf[:, 0:2, :] = xz
    xbuf[:, L + 2:L + 4, :] = xz
    hbuf[:, 0:2, :] = hz
    hbuf[:, L + 2:L + 4, :] = hz

    # Stage x into its halo scratch (written exactly once).
    x_bf = x_ref[...]                                         # (Bn, L, C) bf16
    xbuf[:, 2:2 + L, :] = x_bf

    # conv1 -> bn1 -> relu    (elementwise in f32; MXU K = real C)
    h = jnp.maximum(conv5(xbuf, w1_ref) * s1_ref[...] + b1_ref[...], 0.0)

    # conv2 -> bn2 -> relu    (h's padded lanes are exactly 0: zero weight
    # output-cols + zero scale/bias keep the lane-pad invariant)
    hbuf[:, 2:2 + L, :] = h.astype(jnp.bfloat16).reshape(Bn, L, Cp)
    h = jnp.maximum(conv5(hbuf, w2_ref) * s2_ref[...] + b2_ref[...], 0.0)

    # residual add + relu (f32); store only the real C channels, bf16.
    res = x_bf.astype(jnp.float32).reshape(R, C)
    out = jnp.maximum(h[:, :C] + res, 0.0)
    o_ref[...] = out.reshape(Bn, L, C).astype(o_ref.dtype)


@jax.jit
def basicblock_forward(x_ncl, w1, w2, g1, be1, m1, v1, g2, be2, m2, v2,
                       eps=1e-5):
    """x_ncl: (N, C, L) float32 (PyTorch NCW layout).  Returns (N, C, L) f32."""
    N, C, L = x_ncl.shape
    C_pad = ((C + 127) // 128) * 128          # lane-dense channel width (VMEM only)

    # Fold BatchNorm (inference) into per-channel scale / bias.
    s1 = g1 / jnp.sqrt(v1 + eps)
    b1 = be1 - m1 * s1
    s2 = g2 / jnp.sqrt(v2 + eps)
    b2 = be2 - m2 * s2

    # ---- layout glue (plain JAX, outside the kernel) ------------------------
    # NCW -> NLC bf16; HBM carries the REAL channel count (no lane padding).
    x_nlc = jnp.transpose(x_ncl, (0, 2, 1)).astype(jnp.bfloat16)     # (N, L, C)

    # Block sizing: big steps (amortize ~0.35us/step), bounded so the f32
    # intermediates stay well inside v7x's 64 MiB VMEM.
    rows_cap = max(256, min(2048, (6 * 1024 * 1024) // (4 * C_pad)))
    Bn = max(1, min(N, rows_cap // max(L, 1)))
    if N >= 2:
        Bn = min(Bn, (N + 1) // 2)       # grid >= 2 => both v7x TCs get work
    steps = pl.cdiv(N, Bn)
    N_pad = steps * Bn
    if N_pad != N:                       # awkward N: pad batch, slice off later
        x_nlc = jnp.pad(x_nlc, ((0, N_pad - N), (0, 0), (0, 0)))

    # Weights (Cout, Cin, K) -> per-tap (K, Cin, Cout); conv1 pads only the
    # output axis (K = real C), conv2 pads both (its input is the padded h).
    wk1 = jnp.transpose(w1, (2, 1, 0))
    w1f = jnp.pad(wk1, ((0, 0), (0, 0), (0, C_pad - C))).astype(jnp.bfloat16)
    wk2 = jnp.transpose(w2, (2, 1, 0))
    w2f = jnp.pad(wk2, ((0, 0), (0, C_pad - C), (0, C_pad - C))).astype(jnp.bfloat16)

    def prep_sb(v_):
        # zero-pad: relu(0*s + 0) = 0 keeps padded lanes identically zero.
        return jnp.pad(v_, (0, C_pad - C)).reshape(1, C_pad).astype(jnp.float32)

    s1r, b1r, s2r, b2r = prep_sb(s1), prep_sb(b1), prep_sb(s2), prep_sb(b2)

    out_nlc = pl.pallas_call(
        _basicblock_kernel,
        out_shape=jax.ShapeDtypeStruct((N_pad, L, C), jnp.bfloat16),
        grid_spec=pltpu.PrefetchScalarGridSpec(
            num_scalar_prefetch=0,
            grid=(steps,),
            in_specs=[
                pl.BlockSpec((Bn, L, C), lambda n: (n, 0, 0)),          # x
                pl.BlockSpec((5, C, C_pad), lambda n: (0, 0, 0)),       # w1 taps
                pl.BlockSpec((5, C_pad, C_pad), lambda n: (0, 0, 0)),   # w2 taps
                pl.BlockSpec((1, C_pad), lambda n: (0, 0)),             # s1
                pl.BlockSpec((1, C_pad), lambda n: (0, 0)),             # b1
                pl.BlockSpec((1, C_pad), lambda n: (0, 0)),             # s2
                pl.BlockSpec((1, C_pad), lambda n: (0, 0)),             # b2
            ],
            out_specs=pl.BlockSpec((Bn, L, C), lambda n: (n, 0, 0)),
            scratch_shapes=[
                pltpu.VMEM((Bn, L + 4, C), jnp.bfloat16),               # x halo
                pltpu.VMEM((Bn, L + 4, C_pad), jnp.bfloat16),           # h halo
            ],
        ),
        compiler_params=pltpu.CompilerParams(
            dimension_semantics=("parallel",),
            vmem_limit_bytes=48 * 1024 * 1024),
    )(x_nlc, w1f, w2f, s1r, b1r, s2r, b2r)

    # Drop batch padding, back to NCW, cast to f32 once at the block edge.
    return jnp.transpose(out_nlc[:N].astype(jnp.float32), (0, 2, 1))


def _reference_forward(x, w1, w2, g1, be1, m1, v1, g2, be2, m2, v2, eps=1e-5):
    """Pure-JAX f32 reference (NCW conv via lax.conv_general_dilated)."""
    def conv(inp, w):
        return jax.lax.conv_general_dilated(
            inp, w, window_strides=(1,), padding=((2, 2),),
            dimension_numbers=("NCH", "OIH", "NCH"))

    def bn(inp, g, b, m, v):
        s = g / jnp.sqrt(v + eps)
        return inp * s[None, :, None] + (b - m * s)[None, :, None]

    h = jax.nn.relu(bn(conv(x, w1), g1, be1, m1, v1))
    h = jax.nn.relu(bn(conv(h, w2), g2, be2, m2, v2))
    return jax.nn.relu(h + x)


if __name__ == "__main__":
    N, C, L = 2, 8, 16          # small: batch=2, channels=8, length=16
    key = jax.random.PRNGKey(0)
    ks = jax.random.split(key, 9)

    x = jax.random.normal(ks[0], (N, C, L), dtype=jnp.float32)

    # conv weights (Cout, Cin, K) as in PyTorch, bias=False
    w1 = jax.random.normal(ks[1], (C, C, 5), dtype=jnp.float32) * 0.1
    w2 = jax.random.normal(ks[2], (C, C, 5), dtype=jnp.float32) * 0.1

    # BatchNorm1d params (inference statistics), deterministic
    g1 = 1.0 + 0.1 * jax.random.normal(ks[3], (C,), dtype=jnp.float32)
    be1 = 0.1 * jax.random.normal(ks[4], (C,), dtype=jnp.float32)
    m1 = 0.1 * jax.random.normal(ks[5], (C,), dtype=jnp.float32)
    v1 = 1.0 + 0.1 * jax.nn.softplus(jax.random.normal(ks[6], (C,),
                                                       dtype=jnp.float32))
    g2 = 1.0 + 0.1 * jax.random.normal(ks[7], (C,), dtype=jnp.float32)
    be2 = 0.1 * jax.random.normal(ks[8], (C,), dtype=jnp.float32)
    m2 = jnp.zeros((C,), dtype=jnp.float32)
    v2 = jnp.ones((C,), dtype=jnp.float32)

    out = basicblock_forward(x, w1, w2, g1, be1, m1, v1, g2, be2, m2, v2)
    out = jax.block_until_ready(out)

    ref = _reference_forward(x, w1, w2, g1, be1, m1, v1, g2, be2, m2, v2)
    assert out.shape == (N, C, L)
    # bf16 MXU operands + bf16 HBM writeback => compare with bf16-level
    # tolerance against the f32 reference.
    assert jnp.allclose(out, ref, atol=4e-2, rtol=4e-2), (
        "mismatch vs reference, max abs err = %e"
        % float(jnp.max(jnp.abs(out - ref))))

    print("KERNEL_OK")
</pallas_src>

<mosaic_0001>
module attributes {stable_mosaic.version = 11 : i64} {
  func.func @_basicblock_kernel(%arg0: i32, %arg1: memref<1x16x8xbf16, #tpu.memory_space<vmem>>, %arg2: memref<5x8x128xbf16, #tpu.memory_space<vmem>>, %arg3: memref<5x128x128xbf16, #tpu.memory_space<vmem>>, %arg4: memref<1x128xf32, #tpu.memory_space<vmem>>, %arg5: memref<1x128xf32, #tpu.memory_space<vmem>>, %arg6: memref<1x128xf32, #tpu.memory_space<vmem>>, %arg7: memref<1x128xf32, #tpu.memory_space<vmem>>, %arg8: memref<1x16x8xbf16, #tpu.memory_space<vmem>>, %arg9: memref<1x20x8xbf16, #tpu.memory_space<vmem>>, %arg10: memref<1x20x128xbf16, #tpu.memory_space<vmem>>) attributes {dimension_semantics = [#tpu.dimension_semantics<parallel>], iteration_bounds = array<i64: 2>, scalar_prefetch = 0 : i64, scratch_operands = 2 : i64, tpu.core_type = #tpu.core_type<tc>, window_params = [{transform_indices = @transform_0, window_bounds = array<i64: 1, 16, 8>}, {pipeline_mode = #tpu.pipeline_mode<synchronous>, transform_indices = @transform_1, window_bounds = array<i64: 5, 8, 128>}, {pipeline_mode = #tpu.pipeline_mode<synchronous>, transform_indices = @transform_2, window_bounds = array<i64: 5, 128, 128>}, {pipeline_mode = #tpu.pipeline_mode<synchronous>, transform_indices = @transform_3, window_bounds = array<i64: 1, 128>}, {pipeline_mode = #tpu.pipeline_mode<synchronous>, transform_indices = @transform_4, window_bounds = array<i64: 1, 128>}, {pipeline_mode = #tpu.pipeline_mode<synchronous>, transform_indices = @transform_5, window_bounds = array<i64: 1, 128>}, {pipeline_mode = #tpu.pipeline_mode<synchronous>, transform_indices = @transform_6, window_bounds = array<i64: 1, 128>}, {transform_indices = @transform_7, window_bounds = array<i64: 1, 16, 8>}]} {
    %cst = arith.constant 0.000000e+00 : bf16
    %0 = vector.broadcast %cst : bf16 to vector<1x2x8xbf16>
    %cst_0 = arith.constant 0.000000e+00 : bf16
    %1 = vector.broadcast %cst_0 : bf16 to vector<1x2x128xbf16>
    %c0 = arith.constant 0 : index
    %c0_1 = arith.constant 0 : index
    %c0_2 = arith.constant 0 : index
    %2 = vector.load %arg9[%c0, %c0_1, %c0_2] : memref<1x20x8xbf16, #tpu.memory_space<vmem>>, vector<1x2x8xbf16>
    tpu.vector_store %arg9[%c0, %c0_1, %c0_2], %0 {strides = array<i32>} : memref<1x20x8xbf16, #tpu.memory_space<vmem>>, vector<1x2x8xbf16>,
    %c0_3 = arith.constant 0 : index
    %c18 = arith.constant 18 : index
    %c0_4 = arith.constant 0 : index
    %3 = vector.load %arg9[%c0_3, %c18, %c0_4] : memref<1x20x8xbf16, #tpu.memory_space<vmem>>, vector<1x2x8xbf16>
    tpu.vector_store %arg9[%c0_3, %c18, %c0_4], %0 {strides = array<i32>} : memref<1x20x8xbf16, #tpu.memory_space<vmem>>, vector<1x2x8xbf16>,
    %c0_5 = arith.constant 0 : index
    %c0_6 = arith.constant 0 : index
    %c0_7 = arith.constant 0 : index
    %4 = vector.load %arg10[%c0_5, %c0_6, %c0_7] : memref<1x20x128xbf16, #tpu.memory_space<vmem>>, vector<1x2x128xbf16>
    tpu.vector_store %arg10[%c0_5, %c0_6, %c0_7], %1 {strides = array<i32>} : memref<1x20x128xbf16, #tpu.memory_space<vmem>>, vector<1x2x128xbf16>,
    %c0_8 = arith.constant 0 : index
    %c18_9 = arith.constant 18 : index
    %c0_10 = arith.constant 0 : index
    %5 = vector.load %arg10[%c0_8, %c18_9, %c0_10] : memref<1x20x128xbf16, #tpu.memory_space<vmem>>, vector<1x2x128xbf16>
    tpu.vector_store %arg10[%c0_8, %c18_9, %c0_10], %1 {strides = array<i32>} : memref<1x20x128xbf16, #tpu.memory_space<vmem>>, vector<1x2x128xbf16>,
    %c0_11 = arith.constant 0 : index
    %c0_12 = arith.constant 0 : index
    %c0_13 = arith.constant 0 : index
    %6 = vector.load %arg1[%c0_11, %c0_12, %c0_13] : memref<1x16x8xbf16, #tpu.memory_space<vmem>>, vector<1x16x8xbf16>
    %c0_14 = arith.constant 0 : index
    %c2 = arith.constant 2 : index
    %c0_15 = arith.constant 0 : index
    %7 = vector.load %arg9[%c0_14, %c2, %c0_15] : memref<1x20x8xbf16, #tpu.memory_space<vmem>>, vector<1x16x8xbf16>
    tpu.vector_store %arg9[%c0_14, %c2, %c0_15], %6 {strides = array<i32>} : memref<1x20x8xbf16, #tpu.memory_space<vmem>>, vector<1x16x8xbf16>,
    %c0_16 = arith.constant 0 : index
    %c0_17 = arith.constant 0 : index
    %c0_18 = arith.constant 0 : index
    %8 = vector.load %arg9[%c0_16, %c0_17, %c0_18] : memref<1x20x8xbf16, #tpu.memory_space<vmem>>, vector<1x16x8xbf16>
    %9 = vector.shape_cast %8 : vector<1x16x8xbf16> to vector<16x8xbf16>
    %c0_19 = arith.constant 0 : index
    %c0_20 = arith.constant 0 : index
    %c0_21 = arith.constant 0 : index
    %10 = vector.load %arg2[%c0_19, %c0_20, %c0_21] : memref<5x8x128xbf16, #tpu.memory_space<vmem>>, vector<1x8x128xbf16>
    %11 = vector.shape_cast %10 : vector<1x8x128xbf16> to vector<8x128xbf16>
    %cst_22 = arith.constant dense<0.000000e+00> : vector<16x128xf32>
    %12 = tpu.matmul %9, %11, %cst_22 {dimension_numbers = #tpu.dot_dimension_numbers<[1], [0], [0], [1], [0, 0, 1, 1], [], []>} : vector<16x8xbf16>, vector<8x128xbf16>, vector<16x128xf32> -> vector<16x128xf32>
    %c0_23 = arith.constant 0 : index
    %c1 = arith.constant 1 : index
    %c0_24 = arith.constant 0 : index
    %13 = vector.load %arg9[%c0_23, %c1, %c0_24] : memref<1x20x8xbf16, #tpu.memory_space<vmem>>, vector<1x16x8xbf16>
    %14 = vector.shape_cast %13 : vector<1x16x8xbf16> to vector<16x8xbf16>
    %c1_25 = arith.constant 1 : index
    %c0_26 = arith.constant 0 : index
    %c0_27 = arith.constant 0 : index
    %15 = vector.load %arg2[%c1_25, %c0_26, %c0_27] : memref<5x8x128xbf16, #tpu.memory_space<vmem>>, vector<1x8x128xbf16>
    %16 = vector.shape_cast %15 : vector<1x8x128xbf16> to vector<8x128xbf16>
    %cst_28 = arith.constant dense<0.000000e+00> : vector<16x128xf32>
    %17 = tpu.matmul %14, %16, %cst_28 {dimension_numbers = #tpu.dot_dimension_numbers<[1], [0], [0], [1], [0, 0, 1, 1], [], []>} : vector<16x8xbf16>, vector<8x128xbf16>, vector<16x128xf32> -> vector<16x128xf32>
    %18 = arith.addf %12, %17 : vector<16x128xf32>
    %c0_29 = arith.constant 0 : index
    %c2_30 = arith.constant 2 : index
    %c0_31 = arith.constant 0 : index
    %19 = vector.load %arg9[%c0_29, %c2_30, %c0_31] : memref<1x20x8xbf16, #tpu.memory_space<vmem>>, vector<1x16x8xbf16>
    %20 = vector.shape_cast %19 : vector<1x16x8xbf16> to vector<16x8xbf16>
    %c2_32 = arith.constant 2 : index
    %c0_33 = arith.constant 0 : index
    %c0_34 = arith.constant 0 : index
    %21 = vector.load %arg2[%c2_32, %c0_33, %c0_34] : memref<5x8x128xbf16, #tpu.memory_space<vmem>>, vector<1x8x128xbf16>
    %22 = vector.shape_cast %21 : vector<1x8x128xbf16> to vector<8x128xbf16>
    %cst_35 = arith.constant dense<0.000000e+00> : vector<16x128xf32>
    %23 = tpu.matmul %20, %22, %cst_35 {dimension_numbers = #tpu.dot_dimension_numbers<[1], [0], [0], [1], [0, 0, 1, 1], [], []>} : vector<16x8xbf16>, vector<8x128xbf16>, vector<16x128xf32> -> vector<16x128xf32>
    %24 = arith.addf %18, %23 : vector<16x128xf32>
    %c0_36 = arith.constant 0 : index
    %c3 = arith.constant 3 : index
    %c0_37 = arith.constant 0 : index
    %25 = vector.load %arg9[%c0_36, %c3, %c0_37] : memref<1x20x8xbf16, #tpu.memory_space<vmem>>, vector<1x16x8xbf16>
    %26 = vector.shape_cast %25 : vector<1x16x8xbf16> to vector<16x8xbf16>
    %c3_38 = arith.constant 3 : index
    %c0_39 = arith.constant 0 : index
    %c0_40 = arith.constant 0 : index
    %27 = vector.load %arg2[%c3_38, %c0_39, %c0_40] : memref<5x8x128xbf16, #tpu.memory_space<vmem>>, vector<1x8x128xbf16>
    %28 = vector.shape_cast %27 : vector<1x8x128xbf16> to vector<8x128xbf16>
    %cst_41 = arith.constant dense<0.000000e+00> : vector<16x128xf32>
    %29 = tpu.matmul %26, %28, %cst_41 {dimension_numbers = #tpu.dot_dimension_numbers<[1], [0], [0], [1], [0, 0, 1, 1], [], []>} : vector<16x8xbf16>, vector<8x128xbf16>, vector<16x128xf32> -> vector<16x128xf32>
    %30 = arith.addf %24, %29 : vector<16x128xf32>
    %c0_42 = arith.constant 0 : index
    %c4 = arith.constant 4 : index
    %c0_43 = arith.constant 0 : index
    %31 = vector.load %arg9[%c0_42, %c4, %c0_43] : memref<1x20x8xbf16, #tpu.memory_space<vmem>>, vector<1x16x8xbf16>
    %32 = vector.shape_cast %31 : vector<1x16x8xbf16> to vector<16x8xbf16>
    %c4_44 = arith.constant 4 : index
    %c0_45 = arith.constant 0 : index
    %c0_46 = arith.constant 0 : index
    %33 = vector.load %arg2[%c4_44, %c0_45, %c0_46] : memref<5x8x128xbf16, #tpu.memory_space<vmem>>, vector<1x8x128xbf16>
    %34 = vector.shape_cast %33 : vector<1x8x128xbf16> to vector<8x128xbf16>
    %cst_47 = arith.constant dense<0.000000e+00> : vector<16x128xf32>
    %35 = tpu.matmul %32, %34, %cst_47 {dimension_numbers = #tpu.dot_dimension_numbers<[1], [0], [0], [1], [0, 0, 1, 1], [], []>} : vector<16x8xbf16>, vector<8x128xbf16>, vector<16x128xf32> -> vector<16x128xf32>
    %36 = arith.addf %30, %35 : vector<16x128xf32>
    %c0_48 = arith.constant 0 : index
    %c0_49 = arith.constant 0 : index
    %37 = vector.load %arg4[%c0_48, %c0_49] : memref<1x128xf32, #tpu.memory_space<vmem>>, vector<1x128xf32>
    %38 = vector.broadcast %37 : vector<1x128xf32> to vector<16x128xf32>
    %39 = arith.mulf %36, %38 : vector<16x128xf32>
    %c0_50 = arith.constant 0 : index
    %c0_51 = arith.constant 0 : index
    %40 = vector.load %arg5[%c0_50, %c0_51] : memref<1x128xf32, #tpu.memory_space<vmem>>, vector<1x128xf32>
    %41 = vector.broadcast %40 : vector<1x128xf32> to vector<16x128xf32>
    %42 = arith.addf %39, %41 : vector<16x128xf32>
    %cst_52 = arith.constant 0.000000e+00 : f32
    %43 = vector.broadcast %cst_52 : f32 to vector<16x128xf32>
    %44 = arith.maximumf %42, %43 : vector<16x128xf32>
    %45 = arith.truncf %44 : vector<16x128xf32> to vector<16x128xbf16>
    %46 = vector.shape_cast %45 : vector<16x128xbf16> to vector<1x16x128xbf16>
    %c0_53 = arith.constant 0 : index
    %c2_54 = arith.constant 2 : index
    %c0_55 = arith.constant 0 : index
    %47 = vector.load %arg10[%c0_53, %c2_54, %c0_55] : memref<1x20x128xbf16, #tpu.memory_space<vmem>>, vector<1x16x128xbf16>
    tpu.vector_store %arg10[%c0_53, %c2_54, %c0_55], %46 {strides = array<i32>} : memref<1x20x128xbf16, #tpu.memory_space<vmem>>, vector<1x16x128xbf16>,
    %c0_56 = arith.constant 0 : index
    %c0_57 = arith.constant 0 : index
    %c0_58 = arith.constant 0 : index
    %48 = vector.load %arg10[%c0_56, %c0_57, %c0_58] : memref<1x20x128xbf16, #tpu.memory_space<vmem>>, vector<1x16x128xbf16>
    %49 = vector.shape_cast %48 : vector<1x16x128xbf16> to vector<16x128xbf16>
    %c0_59 = arith.constant 0 : index
    %c0_60 = arith.constant 0 : index
    %c0_61 = arith.constant 0 : index
    %50 = vector.load %arg3[%c0_59, %c0_60, %c0_61] : memref<5x128x128xbf16, #tpu.memory_space<vmem>>, vector<1x128x128xbf16>
    %51 = vector.shape_cast %50 : vector<1x128x128xbf16> to vector<128x128xbf16>
    %cst_62 = arith.constant dense<0.000000e+00> : vector<16x128xf32>
    %52 = tpu.matmul %49, %51, %cst_62 {dimension_numbers = #tpu.dot_dimension_numbers<[1], [0], [0], [1], [0, 0, 1, 1], [], []>} : vector<16x128xbf16>, vector<128x128xbf16>, vector<16x128xf32> -> vector<16x128xf32>
    %c0_63 = arith.constant 0 : index
    %c1_64 = arith.constant 1 : index
    %c0_65 = arith.constant 0 : index
    %53 = vector.load %arg10[%c0_63, %c1_64, %c0_65] : memref<1x20x128xbf16, #tpu.memory_space<vmem>>, vector<1x16x128xbf16>
    %54 = vector.shape_cast %53 : vector<1x16x128xbf16> to vector<16x128xbf16>
    %c1_66 = arith.constant 1 : index
    %c0_67 = arith.constant 0 : index
    %c0_68 = arith.constant 0 : index
    %55 = vector.load %arg3[%c1_66, %c0_67, %c0_68] : memref<5x128x128xbf16, #tpu.memory_space<vmem>>, vector<1x128x128xbf16>
    %56 = vector.shape_cast %55 : vector<1x128x128xbf16> to vector<128x128xbf16>
    %cst_69 = arith.constant dense<0.000000e+00> : vector<16x128xf32>
    %57 = tpu.matmul %54, %56, %cst_69 {dimension_numbers = #tpu.dot_dimension_numbers<[1], [0], [0], [1], [0, 0, 1, 1], [], []>} : vector<16x128xbf16>, vector<128x128xbf16>, vector<16x128xf32> -> vector<16x128xf32>
    %58 = arith.addf %52, %57 : vector<16x128xf32>
    %c0_70 = arith.constant 0 : index
    %c2_71 = arith.constant 2 : index
    %c0_72 = arith.constant 0 : index
    %59 = vector.load %arg10[%c0_70, %c2_71, %c0_72] : memref<1x20x128xbf16, #tpu.memory_space<vmem>>, vector<1x16x128xbf16>
    %60 = vector.shape_cast %59 : vector<1x16x128xbf16> to vector<16x128xbf16>
    %c2_73 = arith.constant 2 : index
    %c0_74 = arith.constant 0 : index
    %c0_75 = arith.constant 0 : index
    %61 = vector.load %arg3[%c2_73, %c0_74, %c0_75] : memref<5x128x128xbf16, #tpu.memory_space<vmem>>, vector<1x128x128xbf16>
    %62 = vector.shape_cast %61 : vector<1x128x128xbf16> to vector<128x128xbf16>
    %cst_76 = arith.constant dense<0.000000e+00> : vector<16x128xf32>
    %63 = tpu.matmul %60, %62, %cst_76 {dimension_numbers = #tpu.dot_dimension_numbers<[1], [0], [0], [1], [0, 0, 1, 1], [], []>} : vector<16x128xbf16>, vector<128x128xbf16>, vector<16x128xf32> -> vector<16x128xf32>
    %64 = arith.addf %58, %63 : vector<16x128xf32>
    %c0_77 = arith.constant 0 : index
    %c3_78 = arith.constant 3 : index
    %c0_79 = arith.constant 0 : index
    %65 = vector.load %arg10[%c0_77, %c3_78, %c0_79] : memref<1x20x128xbf16, #tpu.memory_space<vmem>>, vector<1x16x128xbf16>
    %66 = vector.shape_cast %65 : vector<1x16x128xbf16> to vector<16x128xbf16>
    %c3_80 = arith.constant 3 : index
    %c0_81 = arith.constant 0 : index
    %c0_82 = arith.constant 0 : index
    %67 = vector.load %arg3[%c3_80, %c0_81, %c0_82] : memref<5x128x128xbf16, #tpu.memory_space<vmem>>, vector<1x128x128xbf16>
    %68 = vector.shape_cast %67 : vector<1x128x128xbf16> to vector<128x128xbf16>
    %cst_83 = arith.constant dense<0.000000e+00> : vector<16x128xf32>
    %69 = tpu.matmul %66, %68, %cst_83 {dimension_numbers = #tpu.dot_dimension_numbers<[1], [0], [0], [1], [0, 0, 1, 1], [], []>} : vector<16x128xbf16>, vector<128x128xbf16>, vector<16x128xf32> -> vector<16x128xf32>
    %70 = arith.addf %64, %69 : vector<16x128xf32>
    %c0_84 = arith.constant 0 : index
    %c4_85 = arith.constant 4 : index
    %c0_86 = arith.constant 0 : index
    %71 = vector.load %arg10[%c0_84, %c4_85, %c0_86] : memref<1x20x128xbf16, #tpu.memory_space<vmem>>, vector<1x16x128xbf16>
    %72 = vector.shape_cast %71 : vector<1x16x128xbf16> to vector<16x128xbf16>
    %c4_87 = arith.constant 4 : index
    %c0_88 = arith.constant 0 : index
    %c0_89 = arith.constant 0 : index
    %73 = vector.load %arg3[%c4_87, %c0_88, %c0_89] : memref<5x128x128xbf16, #tpu.memory_space<vmem>>, vector<1x128x128xbf16>
    %74 = vector.shape_cast %73 : vector<1x128x128xbf16> to vector<128x128xbf16>
    %cst_90 = arith.constant dense<0.000000e+00> : vector<16x128xf32>
    %75 = tpu.matmul %72, %74, %cst_90 {dimension_numbers = #tpu.dot_dimension_numbers<[1], [0], [0], [1], [0, 0, 1, 1], [], []>} : vector<16x128xbf16>, vector<128x128xbf16>, vector<16x128xf32> -> vector<16x128xf32>
    %76 = arith.addf %70, %75 : vector<16x128xf32>
    %c0_91 = arith.constant 0 : index
    %c0_92 = arith.constant 0 : index
    %77 = vector.load %arg6[%c0_91, %c0_92] : memref<1x128xf32, #tpu.memory_space<vmem>>, vector<1x128xf32>
    %78 = vector.broadcast %77 : vector<1x128xf32> to vector<16x128xf32>
    %79 = arith.mulf %76, %78 : vector<16x128xf32>
    %c0_93 = arith.constant 0 : index
    %c0_94 = arith.constant 0 : index
    %80 = vector.load %arg7[%c0_93, %c0_94] : memref<1x128xf32, #tpu.memory_space<vmem>>, vector<1x128xf32>
    %81 = vector.broadcast %80 : vector<1x128xf32> to vector<16x128xf32>
    %82 = arith.addf %79, %81 : vector<16x128xf32>
    %cst_95 = arith.constant 0.000000e+00 : f32
    %83 = vector.broadcast %cst_95 : f32 to vector<16x128xf32>
    %84 = arith.maximumf %82, %83 : vector<16x128xf32>
    %85 = arith.extf %6 : vector<1x16x8xbf16> to vector<1x16x8xf32>
    %86 = vector.shape_cast %85 : vector<1x16x8xf32> to vector<16x8xf32>
    %87 = vector.extract_strided_slice %84 {offsets = [0, 0], sizes = [16, 8], strides = [1, 1]} : vector<16x128xf32> to vector<16x8xf32>
    %88 = arith.addf %87, %86 : vector<16x8xf32>
    %cst_96 = arith.constant 0.000000e+00 : f32
    %89 = vector.broadcast %cst_96 : f32 to vector<16x8xf32>
    %90 = arith.maximumf %88, %89 : vector<16x8xf32>
    %91 = vector.shape_cast %90 : vector<16x8xf32> to vector<1x16x8xf32>
    %92 = arith.truncf %91 : vector<1x16x8xf32> to vector<1x16x8xbf16>
    %c0_97 = arith.constant 0 : index
    %c0_98 = arith.constant 0 : index
    %c0_99 = arith.constant 0 : index
    %93 = vector.load %arg8[%c0_97, %c0_98, %c0_99] : memref<1x16x8xbf16, #tpu.memory_space<vmem>>, vector<1x16x8xbf16>
    tpu.vector_store %arg8[%c0_97, %c0_98, %c0_99], %92 {strides = array<i32>} : memref<1x16x8xbf16, #tpu.memory_space<vmem>>, vector<1x16x8xbf16>,
    return
  }
  func.func @transform_0(%arg0: i32) -> (i32, i32, i32) {
    %c0_i32 = arith.constant 0 : i32
    %c0_i32_0 = arith.constant 0 : i32
    %c0_i32_1 = arith.constant 0 : i32
    return %arg0, %c0_i32, %c0_i32_0 : i32, i32, i32
  }
  func.func @transform_1(%arg0: i32) -> (i32, i32, i32) {
    %c0_i32 = arith.constant 0 : i32
    %c0_i32_0 = arith.constant 0 : i32
    %c0_i32_1 = arith.constant 0 : i32
    %c0_i32_2 = arith.constant 0 : i32
    return %c0_i32, %c0_i32_0, %c0_i32_1 : i32, i32, i32
  }
  func.func @transform_2(%arg0: i32) -> (i32, i32, i32) {
    %c0_i32 = arith.constant 0 : i32
    %c0_i32_0 = arith.constant 0 : i32
    %c0_i32_1 = arith.constant 0 : i32
    %c0_i32_2 = arith.constant 0 : i32
    return %c0_i32, %c0_i32_0, %c0_i32_1 : i32, i32, i32
  }
  func.func @transform_3(%arg0: i32) -> (i32, i32) {
    %c0_i32 = arith.constant 0 : i32
    %c0_i32_0 = arith.constant 0 : i32
    %c0_i32_1 = arith.constant 0 : i32
    return %c0_i32, %c0_i32_0 : i32, i32
  }
  func.func @transform_4(%arg0: i32) -> (i32, i32) {
    %c0_i32 = arith.constant 0 : i32
    %c0_i32_0 = arith.constant 0 : i32
    %c0_i32_1 = arith.constant 0 : i32
    return %c0_i32, %c0_i32_0 : i32, i32
  }
  func.func @transform_5(%arg0: i32) -> (i32, i32) {
    %c0_i32 = arith.constant 0 : i32
    %c0_i32_0 = arith.constant 0 : i32
    %c0_i32_1 = arith.constant 0 : i32
    return %c0_i32, %c0_i32_0 : i32, i32
  }
  func.func @transform_6(%arg0: i32) -> (i32, i32) {
    %c0_i32 = arith.constant 0 : i32
    %c0_i32_0 = arith.constant 0 : i32
    %c0_i32_1 = arith.constant 0 : i32
    return %c0_i32, %c0_i32_0 : i32, i32
  }
  func.func @transform_7(%arg0: i32) -> (i32, i32, i32) {
    %c0_i32 = arith.constant 0 : i32
    %c0_i32_0 = arith.constant 0 : i32
    %c0_i32_1 = arith.constant 0 : i32
    return %arg0, %c0_i32, %c0_i32_0 : i32, i32, i32
  }
}

</mosaic_0001>

<bundles_post_ra>
// kernel: basicblock_forward.1
= control target key start
LH: loop header
LB: loop body
LE: loop exit
PB: predicated region body
PF: predicated region fallthrough
CT: control target
= control target key end

     0   :  { %s1411_s24 = smov 0   ;;  %s1623_s0 = inlined_call_operand.vmem [shape: bf16[2,16,8], index: 0, kind: input, shape index: {}]   ;;  %s1624_s1 = inlined_call_operand.vmem [shape: bf16[5,8,128], index: 1, kind: input, shape index: {}]   ;;  %s1625_s2 = inlined_call_operand.vmem [shape: bf16[5,128,128], index: 2, kind: input, shape index: {}]   ;;  %s1626_s3 = inlined_call_operand.vmem [shape: f32[1,128], index: 3, kind: input, shape index: {}]   ;;  %s1627_s4 = inlined_call_operand.vmem [shape: f32[1,128], index: 4, kind: input, shape index: {}]   ;;  %s1628_s5 = inlined_call_operand.vmem [shape: f32[1,128], index: 5, kind: input, shape index: {}]   ;;  %s1629_s6 = inlined_call_operand.vmem [shape: f32[1,128], index: 6, kind: input, shape index: {}]   ;;  %s1630_s7 = inlined_call_operand.vmem [shape: bf16[2,16,8], index: 7, kind: output, shape index: {}]  }
   0x1 LB: > { %s1055_s25 = sadd.s32 4294967295, %s1368_s24   ;;  %p1059_p0 = scmp.ge.s32.totalorder %s1368_s24, 1  ;;  %s1368_s24 = sphi %s1411_s24, %s17_s24  }
   0x2   : > { %p237_p1 = scmp.lt.s32.totalorder %s1368_s24, 3 }
   0x4   : > { %p238_p2 = pnand %p1059_p0, %p237_p1 }
   0x5   : > { %p269_p3 = scmp.lt.s32.totalorder (!%p238_p2), %s1055_s25, 1 }
   0x6   : > { %241 = sbr.rel (%p238_p2) target bundleno = 386 (0x182), region = 48 }
   0xb   : > { %v308_v0 = vld [vmem:[%s1624_s1] sm:$0xf]  ;;  %vm337_vm0 = vcmask 1043456   ;;  %vm280_vm1 = vcmask 57344   ;;  %v1370_v2 = vmov 0   ;;  %vm282_vm2 = vcmask 58369  }
   0xc   : > { %v358_v1 = vsel %vm337_vm0, %v308_v0, 0  ;;  %281 = vst.msk [vmem:[#allocation2] sm:$0x1] %vm280_vm1, %v1370_v2  ;;  %s1634_s25 = smov (!%p269_p3, %s1055_s25), 1  ;;  %vm290_vm3 = vcmask 1040384   ;;  %vm291_vm4 = vcmask 1044484  }
   0xd   : > { %367 = vmatpush.bf16.msra.mxu2 %v358_v1  ;;  %283 = vst.msk [vmem:[#allocation2 + $0x8] sm:$0x2] %vm282_vm2, %v1370_v2  ;;  %v1067_v3 = vld [vmem:[%s1624_s1 + $0x8] sm:$0xf]  ;;  %v1064_v4 = vld [vmem:[%s1624_s1 + $0x4] sm:$0xf]  ;;  %vm1453_vm6 = vmor %vm290_vm3, %vm291_vm4 }
   0xe   : > { %285 = vst [vmem:[#allocation3 + $0x8] sm:$0x2] %v1370_v2  ;;  %s1299_s9 = sshll.u32 %s1634_s25, 3  ;;  %v388_v5 = vsel %vm337_vm0, %v1067_v3, 0  ;;  %v339_v6 = vsel %vm337_vm0, %v1064_v4, 0  ;;  %vm301_vm5 = vcmask 60417  }
   0xf   : > { %284 = vst [vmem:[#allocation3] sm:$0x1] %v1370_v2  ;;  %s273_s12 = scalar_lea.vmem %s1623_s0, %s1299_s9  ;;  %348 = vmatpush.bf16.msra.mxu0 %v339_v6  ;;  %v1069_v7 = vld [vmem:[%s1624_s1 + $0xc] sm:$0xf]  ;;  %v1071_v8 = vld [vmem:[%s1624_s1 + $0x10] sm:$0xf]  ;;  %s278_s29 = scalar_lea.vmem %s1630_s7, %s1299_s9 }
  0x10   : > { %v1446_v9 = vld [vmem:[%s273_s12] sm:$0xf]  ;;  %v1448_v10 = vld [vmem:[%s273_s12 + $0x4] sm:$0xf]  ;;  %v434_v11 = vsel %vm337_vm0, %v1069_v7, 0  ;;  %v466_v12 = vsel %vm337_vm0, %v1071_v8, 0 }
  0x11   : > { %397 = vmatpush.bf16.msrb.mxu2 %v388_v5  ;;  %v293_v14 = vrot.slane %v1446_v9, 7  ;;  %v295_v15 = vrot.slane %v1448_v10, 7  ;;  %vm303_vm7 = vcmask 60416   ;;  %443 = vmatpush.bf16.msra.mxu3 %v434_v11  ;;  %vm333_vm8 = vcmask 64512   ;;  %v1316_v57 = vld [vmem:[%s1625_s2 + $0x78] sm:$0xff]  ;;  %v1315_v59 = vld [vmem:[%s1625_s2 + $0x70] sm:$0xff] }
  0x12   : > { %vm320_vm9 = vsmask.f32 7424  ;;  %vm412_vm10 = vsmask.f32 6400  ;;  %vm380_vm11 = vcmask 1046528   ;;  %vm458_vm12 = vcmask 1045504   ;;  %618 = vmatpush.bf16.msra.mxu1 %v1316_v57 }
  0x13   : > { %475 = vmatpush.bf16.msrb.mxu0 %v466_v12  ;;  %v294_v16 = vrot.slane %v293_v14, 4  ;;  %v297_v17 = vrot.slane %v295_v15, 4  ;;  %302 = vst.msk [vmem:[#allocation2] sm:$0xe] %vm301_vm5, %v293_v14  ;;  %v1308_v58 = vld [vmem:[%s1625_s2 + $0x38] sm:$0xff]  ;;  %v1307_v60 = vld [vmem:[%s1625_s2 + $0x30] sm:$0xff] }
  0x14   : > { %v1314_v61 = vld [vmem:[%s1625_s2 + $0x68] sm:$0xff]  ;;  %v1324_v63 = vld [vmem:[%s1625_s2 + $0xb8] sm:$0xff]  ;;  %v1313_v0 = vld [vmem:[%s1625_s2 + $0x60] sm:$0xff] }
  0x15   : > { %v296_v18 = vsel %vm1453_vm6, %v294_v16, %v295_v15  ;;  %305 = vst.msk [vmem:[#allocation2 + $0x8] sm:$0x1] %vm280_vm1, %v297_v17  ;;  %v1306_v62 = vld [vmem:[%s1625_s2 + $0x28] sm:$0xff]  ;;  %768 = vmatpush.bf16.msrb.mxu3 %v1324_v63  ;;  %v1305_v1 = vld [vmem:[%s1625_s2 + $0x20] sm:$0xff]  ;;  %v1323_v2 = vld [vmem:[%s1625_s2 + $0xb0] sm:$0xff] }
  0x16   : > { %304 = vst.msk [vmem:[#allocation2 + $0x4] sm:$0xf] %vm303_vm7, %v296_v18  ;;  %619 = vmatpush.bf16.msra.mxu1 %v1315_v59  ;;  %v1332_v3 = vld [vmem:[%s1625_s2 + $0xf8] sm:$0xff]  ;;  %v1322_v7 = vld [vmem:[%s1625_s2 + $0xa8] sm:$0xff]  ;;  %v1331_v8 = vld [vmem:[%s1625_s2 + $0xf0] sm:$0xff] }
  0x17   : > { %v1312_v4 = vld [vmem:[%s1625_s2 + $0x58] sm:$0xff]  ;;  %v1311_v12 = vld [vmem:[%s1625_s2 + $0x50] sm:$0xff]  ;;  %v1321_v15 = vld [vmem:[%s1625_s2 + $0xa0] sm:$0xff] }
  0x18   : > { %v1304_v6 = vld [vmem:[%s1625_s2 + $0x18] sm:$0xff]  ;;  %v1303_v14 = vld [vmem:[%s1625_s2 + $0x10] sm:$0xff]  ;;  %v1330_v16 = vld [vmem:[%s1625_s2 + $0xe8] sm:$0xff] }
  0x19   : > { %769 = vmatpush.bf16.msrb.mxu3 %v1323_v2  ;;  %v1310_v17 = vld [vmem:[%s1625_s2 + $0x48] sm:$0xff]  ;;  %v1335_v57 = vld [vmem:[%s1625_s2 + $0x110] sm:$0xff] }
  0x1a   : > { %v374_v19 = vld [vmem:[#allocation2] sm:$0xe]  ;;  %620 = vmatpush.bf16.msra.mxu1 %v1314_v61  ;;  %v1334_v61 = vld [vmem:[%s1625_s2 + $0x108] sm:$0xff] }
  0x1b   : > { %v378_v20 = vunpack.c.l.b16 %v374_v19  ;;  %v452_v44 = vld [vmem:[#allocation2] sm:$0xc]  ;;  %v1302_v19 = vld [vmem:[%s1625_s2 + $0x8] sm:$0xff] }
  0x1c   : > { %v309_v21 = vld [vmem:[#allocation2 + $0x8] sm:$0x1]  ;;  %v456_v50 = vunpack.c.l.b16 %v452_v44 }
  0x1d   : > { %v406_v22 = vld [vmem:[#allocation2 + $0x8] sm:$0x3]  ;;  %v1342_v23 = vld [vmem:[#allocation2] sm:$0xff]   ;;  %v317_v24 = vunpack.c.l.b16 %v309_v21  ;;  %770 = vmatpush.bf16.msrb.mxu3 %v1322_v7 }
  0x1e   : > { %v410_v25 = vunpack.c.l.b16 %v406_v22  ;;  %v1344_v26 = vunpack.c.h.b16 %v1342_v23  ;;  %v322_v27 = vshrl.u32 %v1342_v23, 16  ;;  %v324_v28 = vshll.u32 %v1342_v23, 16  ;;  %1066 = vmatmul.msk.bf16.vlgmr.msra.gmra.mxu2 %vm333_vm8, %v1342_v23  ;;  %621 = vmatpush.bf16.msra.mxu1 %v1313_v0  ;;  %v1329_v21 = vld [vmem:[%s1625_s2 + $0xe0] sm:$0xff] }
  0x1f   : > { %v319_v29 = vpack.c.b16 %v317_v24, %v317_v24  ;;  %681 = vmatpush.bf16.msra.mxu2 %v1308_v58  ;;  %v1309_v23 = vld [vmem:[%s1625_s2 + $0x40] sm:$0xff]  ;;  %v1340_v24 = vld [vmem:[%s1625_s2 + $0x138] sm:$0xff] }
  0x20   : > { %v411_v30 = vpack.c.b16 %v410_v25, %v410_v25  ;;  %v326_v31 = vrot.slane %v324_v28, 1  ;;  %v379_v32 = vpack.c.b16 %v1344_v26, %v378_v20  ;;  %v457_v53 = vpack.c.b16 %v1344_v26, %v456_v50  ;;  %v1320_v20 = vld [vmem:[%s1625_s2 + $0x98] sm:$0xff]  ;;  %v1301_v25 = vld [vmem:[%s1625_s2] sm:$0xff]  ;;  %v1319_v26 = vld [vmem:[%s1625_s2 + $0x90] sm:$0xff] }
  0x21   : > { %v329_v33 = vshll.u32 %v319_v29, 16  ;;  %v382_v49 = vrot.slane %v319_v29, 1  ;;  %771 = vmatpush.bf16.msrb.mxu3 %v1321_v15  ;;  %v1339_v28 = vld [vmem:[%s1625_s2 + $0x130] sm:$0xff]  ;;  %v1333_v0 = vld [vmem:[%s1625_s2 + $0x100] sm:$0xff] }
  0x22   : > { %v422_v34 = vshrl.u32 %v411_v30, 16  ;;  %v425_v35 = vshll.u32 %v411_v30, 16  ;;  %v327_v36 = vor.u32 %v326_v31, %v322_v27  ;;  %v414_v37 = vshrl.u32 %v379_v32, 16  ;;  %622 = vmatpush.bf16.msra.mxu1 %v1312_v4  ;;  %v1328_v27 = vld [vmem:[%s1625_s2 + $0xd8] sm:$0xff] }
  0x23   : > { %v417_v38 = vshll.u32 %v379_v32, 16  ;;  %v331_v39 = vrot.slane %v329_v33, 1  ;;  %v381_v48 = vrot.slane %v379_v32, 1  ;;  %v459_v54 = vrot.slane %v457_v53, 2  ;;  %682 = vmatpush.bf16.msra.mxu2 %v1307_v60  ;;  %v1318_v33 = vld [vmem:[%s1625_s2 + $0x88] sm:$0xff]  ;;  %v1336_v53 = vld [vmem:[%s1625_s2 + $0x118] sm:$0xff] }
  0x24   : > { %v424_v40 = vrot.slane %v422_v34, 1  ;;  %v427_v41 = vrot.slane %v425_v35, 2  ;;  %v416_v42 = vrot.slane %v414_v37, 1  ;;  %v460_v55 = vrot.slane %v411_v30, 2  ;;  %v1327_v34 = vld [vmem:[%s1625_s2 + $0xd0] sm:$0xff] }
  0x25   : > { %v419_v43 = vrot.slane %v417_v38, 2  ;;  %v332_v45 = vsel %vm320_vm9, %v327_v36, %v331_v39  ;;  %v383_v52 = vsel %vm380_vm11, %v381_v48, %v382_v49  ;;  %772 = vmatpush.bf16.msrb.mxu3 %v1320_v20  ;;  %v1358_v37 = vld [vmem:[%s1626_s3] ss:$0 sm:$0xff]  ;;  %v1338_v38 = vld [vmem:[%s1625_s2 + $0x128] sm:$0xff] }
  0x26   : > { %v428_v46 = vor.u32 %v427_v41, %v424_v40  ;;  %1065 = vmatmul.msk.bf16.vlgmr.msra.gmra.mxu0 %vm333_vm8, %v332_v45  ;;  %v461_v56 = vsel %vm458_vm12, %v459_v54, %v460_v55  ;;  %623 = vmatpush.bf16.msra.mxu1 %v1311_v12  ;;  %v1317_v39 = vld [vmem:[%s1625_s2 + $0x80] sm:$0xff]  ;;  %v1326_v40 = vld [vmem:[%s1625_s2 + $0xc8] sm:$0xff] }
  0x27   : > { %v420_v47 = vor.u32 %v419_v43, %v416_v42  ;;  %683 = vmatpush.bf16.msra.mxu2 %v1306_v62  ;;  %871 = vmatpush.bf16.msra.mxu0 %v1332_v3  ;;  %v1359_v42 = vld [vmem:[%s1627_s4] ss:$0 sm:$0xff] }
  0x28   : > { %v1337_v43 = vld [vmem:[%s1625_s2 + $0x120] sm:$0xff] }
  0x29   : > { %v429_v51 = vsel %vm412_vm10, %v420_v47, %v428_v46  ;;  %773 = vmatpush.bf16.msrb.mxu3 %v1319_v26  ;;  %v1325_v49 = vld [vmem:[%s1625_s2 + $0xc0] sm:$0xff] }
  0x2a   : > { %1070 = vmatmul.msk.bf16.vlgmr.msra.gmra.mxu3 %vm333_vm8, %v429_v51  ;;  %624 = vmatpush.bf16.msra.mxu1 %v1310_v17 }
  0x2b   : > { %684 = vmatpush.bf16.msra.mxu2 %v1305_v1  ;;  %872 = vmatpush.bf16.msra.mxu0 %v1331_v8 }
  0x2d   : > { %774 = vmatpush.bf16.msrb.mxu3 %v1318_v33 }
  0x2e   : > { %1068 = vmatmul.msk.bf16.vlgmr.msrb.gmra.mxu2 %vm333_vm8, %v383_v52  ;;  %625 = vmatpush.bf16.msra.mxu1 %v1309_v23 }
  0x2f   : > { %685 = vmatpush.bf16.msra.mxu2 %v1304_v6  ;;  %873 = vmatpush.bf16.msra.mxu0 %v1330_v16 }
  0x31   : > { %775 = vmatpush.bf16.msrb.mxu3 %v1317_v39 }
  0x32   : > { %960 = vmatpush.bf16.msrb.mxu1 %v1340_v24 }
  0x33   : > { %686 = vmatpush.bf16.msra.mxu2 %v1303_v14  ;;  %874 = vmatpush.bf16.msra.mxu0 %v1329_v21 }
  0x36   : > { %1072 = vmatmul.msk.bf16.vlgmr.msrb.gmra.mxu0 %vm333_vm8, %v461_v56  ;;  %961 = vmatpush.bf16.msrb.mxu1 %v1339_v28 }
  0x37   : > { %687 = vmatpush.bf16.msra.mxu2 %v1302_v19  ;;  %875 = vmatpush.bf16.msra.mxu0 %v1328_v27 }
  0x3a   : > { %962 = vmatpush.bf16.msrb.mxu1 %v1338_v38 }
  0x3b   : > { %688 = vmatpush.bf16.msra.mxu2 %v1301_v25  ;;  %876 = vmatpush.bf16.msra.mxu0 %v1327_v34 }
  0x3e   : > { %963 = vmatpush.bf16.msrb.mxu1 %v1337_v43 }
  0x3f   : > { %877 = vmatpush.bf16.msra.mxu0 %v1326_v40 }
  0x42   : > { %964 = vmatpush.bf16.msrb.mxu1 %v1336_v53 }
  0x43   : > { %878 = vmatpush.bf16.msra.mxu0 %v1325_v49 }
  0x46   : > { %965 = vmatpush.bf16.msrb.mxu1 %v1335_v57 }
  0x4a   : > { %966 = vmatpush.bf16.msrb.mxu1 %v1334_v61 }
  0x4e   : > { %967 = vmatpush.bf16.msrb.mxu1 %v1333_v0 }
  0xa1   : > { %v369_v5 = vpop.f32.mrf.mxu2 }
  0xa3   : > { %v350_v11 = vpop.f32.mrf.mxu0 }
  0xa4   : > { %v370_v29 = vadd.f32 %v369_v5, %v350_v11 }
  0xa9   : > { %v371_v18 = vpop.f32.mrf.mxu2 }
  0xab   : > { %v352_v22 = vpop.f32.mrf.mxu0 }
  0xac   : > { %v372_v44 = vadd.f32 %v371_v18, %v352_v22 }
  0xad   : > { %v445_v30 = vpop.f32.mrf.mxu3 }
  0xb1   : > { %v399_v31 = vpop.f32.mrf.mxu2 }
  0xb2   : > { %v404_v32 = vadd.f32 %v399_v31, %v370_v29 }
  0xb3   : > { %v477_v35 = vpop.f32.mrf.mxu0 }
  0xb4   : > { %v450_v36 = vadd.f32 %v445_v30, %v404_v32 }
  0xb5   : > { %v447_v50 = vpop.f32.mrf.mxu3 }
  0xb6   : > { %v482_v41 = vadd.f32 %v477_v35, %v450_v36 }
  0xb8   : > { %v488_v45 = vmul.f32 %v1358_v37, %v482_v41 }
  0xb9   : > { %v401_v46 = vpop.f32.mrf.mxu2 }
  0xba   : > { %v494_v47 = vadd.f32 %v1359_v42, %v488_v45  ;;  %v405_v48 = vadd.f32 %v401_v46, %v372_v44 }
  0xbb   : > { %v479_v54 = vpop.f32.mrf.mxu0 }
  0xbc   : > { %v496_v51 = vmax.f32 %v494_v47, 0.0  ;;  %v451_v52 = vadd.f32 %v447_v50, %v405_v48 }
  0xbe   : > { %v498_v55 = vpack.c.bf16 %v496_v51, %v496_v51  ;;  %v483_v56 = vadd.f32 %v479_v54, %v451_v52  ;;  %v1360_v54 = vld [vmem:[%s1628_s5] ss:$0 sm:$0xff] }
  0xc0   : > { %v502_v58 = vrot.slane %v498_v55, 7  ;;  %v489_v59 = vmul.f32 %v1358_v37, %v483_v56 }
  0xc2   : > { %510 = vst [vmem:[#allocation3] sm:$0xe] %v502_v58  ;;  %v495_v60 = vadd.f32 %v1359_v42, %v489_v59  ;;  %v503_v1 = vrot.slane %v502_v58, 4  ;;  %v1361_v59 = vld [vmem:[%s1629_s6] ss:$0 sm:$0xff] }
  0xc4   : > { %v497_v62 = vmax.f32 %v495_v60, 0.0 }
  0xc6   : > { %v499_v63 = vpack.c.bf16 %v497_v62, %v497_v62 }
  0xc8   : > { %v504_v2 = vrot.slane %v499_v63, 7  ;;  %v990_v63 = vunpack.c.l.bf16 %v1446_v9 }
  0xc9   : > { %v695_v5 = vld [vmem:[#allocation3] sm:$0xe] }
  0xca   : > { %v505_v3 = vsel %vm1453_vm6, %v503_v1, %v504_v2  ;;  %v506_v4 = vrot.slane %v504_v2, 4  ;;  %v714_v8 = vunpack.c.l.b16 %v695_v5  ;;  %v887_v39 = vld [vmem:[#allocation3] sm:$0xc] }
  0xcb   : > { %511 = vst [vmem:[#allocation3 + $0x4] sm:$0xf] %v505_v3  ;;  %v906_v40 = vunpack.c.l.b16 %v887_v39 }
  0xcc   : > { %512 = vst [vmem:[#allocation3 + $0x8] sm:$0x1] %v506_v4 }
  0xd2   : > { %v1346_v6 = vld [vmem:[#allocation3] sm:$0xff]  }
  0xd3   : > { %v1348_v7 = vunpack.c.h.b16 %v1346_v6  ;;  %689 = vmatmul.bf16.vlgmr.msra.gmra.mxu2 %v1346_v6  ;;  %v531_v11 = vld [vmem:[#allocation3 + $0x8] sm:$0x1]  ;;  %v560_v12 = vshll.u32 %v1346_v6, 16  ;;  %v558_v21 = vshrl.u32 %v1346_v6, 16 }
  0xd4   : > { %v784_v14 = vld [vmem:[#allocation3 + $0x8] sm:$0x3]  ;;  %v554_v15 = vunpack.c.l.b16 %v531_v11 }
  0xd5   : > { %v803_v16 = vunpack.c.l.b16 %v784_v14  ;;  %v715_v17 = vpack.c.b16 %v1348_v7, %v714_v8  ;;  %v562_v18 = vrot.slane %v560_v12, 1  ;;  %v907_v41 = vpack.c.b16 %v1348_v7, %v906_v40 }
  0xd6   : > { %v556_v19 = vpack.c.b16 %v554_v15, %v554_v15  ;;  %v991_v12 = vunpack.c.l.bf16 %v1448_v10 }
  0xd7   : > { %v804_v20 = vpack.c.b16 %v803_v16, %v803_v16  ;;  %v716_v13 = vrot.slane %v715_v17, 1  ;;  %v806_v22 = vshrl.u32 %v715_v17, 16  ;;  %v809_v23 = vshll.u32 %v715_v17, 16 }
  0xd8   : > { %v717_v24 = vrot.slane %v556_v19, 1  ;;  %v565_v25 = vshll.u32 %v556_v19, 16  ;;  %v563_v28 = vor.u32 %v562_v18, %v558_v21  ;;  %v908_v42 = vrot.slane %v907_v41, 2 }
  0xd9   : > { %v814_v26 = vshrl.u32 %v804_v20, 16  ;;  %v817_v27 = vshll.u32 %v804_v20, 16  ;;  %v808_v29 = vrot.slane %v806_v22, 1  ;;  %v811_v30 = vrot.slane %v809_v23, 2 }
  0xda   : > { %v718_v31 = vsel %vm380_vm11, %v716_v13, %v717_v24  ;;  %v567_v32 = vrot.slane %v565_v25, 1  ;;  %v909_v43 = vrot.slane %v804_v20, 2 }
  0xdb   : > { %v816_v33 = vrot.slane %v814_v26, 1  ;;  %v819_v34 = vrot.slane %v817_v27, 2  ;;  %776 = vmatmul.bf16.vlgmr.msrb.gmra.mxu3 %v718_v31  ;;  %v812_v35 = vor.u32 %v811_v30, %v808_v29 }
  0xdc   : > { %v568_v36 = vsel %vm320_vm9, %v563_v28, %v567_v32  ;;  %v910_v44 = vsel %vm458_vm12, %v908_v42, %v909_v43 }
  0xdd   : > { %v820_v37 = vor.u32 %v819_v34, %v816_v33  ;;  %626 = vmatmul.bf16.vlgmr.msra.gmra.mxu1 %v568_v36 }
  0xdf   : > { %v821_v38 = vsel %vm412_vm10, %v812_v35, %v820_v37 }
  0xe0   : > { %879 = vmatmul.bf16.vlgmr.msra.gmra.mxu0 %v821_v38 }
  0xed   : > { %968 = vmatmul.bf16.vlgmr.msrb.gmra.mxu1 %v910_v44 }
 0x156   : > { %v690_v46 = vpop.f32.mrf.mxu2 }
 0x15a   : > { %v627_v45 = vpop.f32.mrf.mxu1 }
 0x15b   : > { %v691_v49 = vadd.f32 %v690_v46, %v627_v45 }
 0x15d   : > { %v880_v51 = vpop.f32.mrf.mxu0 }
 0x15e   : > { %v777_v47 = vpop.f32.mrf.mxu3  ;;  %v692_v52 = vpop.f32.mrf.mxu2 }
 0x15f   : > { %v782_v50 = vadd.f32 %v777_v47, %v691_v49 }
 0x161   : > { %v885_v53 = vadd.f32 %v880_v51, %v782_v50 }
 0x162   : > { %v629_v48 = vpop.f32.mrf.mxu1 }
 0x163   : > { %v693_v57 = vadd.f32 %v692_v52, %v629_v48 }
 0x165   : > { %v882_v0 = vpop.f32.mrf.mxu0 }
 0x166   : > { %v779_v55 = vpop.f32.mrf.mxu3 }
 0x167   : > { %v783_v60 = vadd.f32 %v779_v55, %v693_v57 }
 0x169   : > { %v886_v2 = vadd.f32 %v882_v0, %v783_v60 }
 0x16a   : > { %v969_v56 = vpop.f32.mrf.mxu1 }
 0x16b   : > { %v974_v58 = vadd.f32 %v969_v56, %v885_v53 }
 0x16d   : > { %v980_v61 = vmul.f32 %v1360_v54, %v974_v58 }
 0x16f   : > { %v986_v62 = vadd.f32 %v1361_v59, %v980_v61 }
 0x171   : > { %v988_v1 = vmax.f32 %v986_v62, 0.0 }
 0x172   : > { %v971_v3 = vpop.f32.mrf.mxu1 }
 0x173   : > { %v992_v4 = vadd.f32 %v990_v63, %v988_v1  ;;  %v975_v5 = vadd.f32 %v971_v3, %v886_v2 }
 0x175   : > { %v994_v6 = vmax.f32 %v992_v4, 0.0  ;;  %v981_v7 = vmul.f32 %v1360_v54, %v975_v5 }
 0x177   : > { %v996_v8 = vpack.c.bf16 %v994_v6, %v994_v6  ;;  %v987_v11 = vadd.f32 %v1361_v59, %v981_v7 }
 0x179   : > { %998 = vst.msk [vmem:[%s278_s29] sm:$0xf] %vm303_vm7, %v996_v8  ;;  %v989_v9 = vmax.f32 %v987_v11, 0.0 }
 0x17b   : > { %v993_v14 = vadd.f32 %v991_v12, %v989_v9 }
 0x17d   : > { %v995_v15 = vmax.f32 %v993_v14, 0.0 }
 0x17f   : > { %v997_v16 = vpack.c.bf16 %v995_v15, %v995_v15 }
 0x181   : > { %999 = vst.msk [vmem:[%s278_s29 + $0x4] sm:$0xf] %vm303_vm7, %v997_v16 }
 0x182 PF: > { %s17_s24 = sadd.s32 1, %s1368_s24  }
 0x183   : > { %p14_p4 = scmp.ge.s32.totalorder %s17_s24, 4  }
 0x185   :  { %16 = sbr.rel (!%p14_p4) target bundleno = 1 (0x1), region = 86 }

</bundles_post_ra>
